<compile_context>
chip_gen: v7x
topology: tpu7x:2x2x1
jax: 0.10.0
libtpu: 0.0.40
codegen_flags: <defaults>
</compile_context>

<pallas_src>
import functools

import jax
import jax.numpy as jnp
from jax import lax
from jax.experimental import pallas as pl
from jax.experimental.pallas import tpu as pltpu

LANES = 128
SUBLANES = 8
ALIGN = SUBLANES * LANES          # 1024 elements
MAX_BLOCK_ROWS = 2048             # (2048, 128) f32 = 1 MiB / stream / buffer


def _cdiv(a, b):
    return -(-a // b)


def _round_up(a, m):
    return _cdiv(a, m) * m


def _num_tensorcores():
    """Best-effort TensorCore count of the local chip (1 if unknown)."""
    try:
        info = pltpu.get_tpu_info()
        for name in ("num_cores", "tensorcore_count", "num_tensorcores",
                     "cores_per_chip", "num_cores_per_chip"):
            v = getattr(info, name, None)
            if isinstance(v, int) and v > 0:
                return v
    except Exception:
        pass
    try:
        if "v7" in jax.devices()[0].device_kind.lower():
            return 2
    except Exception:
        pass
    return 1


def _dice_bce_kernel(p_ref, t_ref, acc_ref, *, rows, steps, block_rows,
                     has_ragged, binary_targets):
    """Accumulates per-lane partials of [-bce, p*t, p+t] into acc (3, 8, 128)
    and reduces them to 3 scalars (stored at [k, 0, 0]) on the last step."""
    i = pl.program_id(1)

    @pl.when(i == 0)
    def _init():
        acc_ref[...] = jnp.zeros_like(acc_ref)

    def accumulate(p, t):
        if binary_targets:
            # Hard {0,1} targets: a single log per element (halves EUP work).
            neg_bce = jnp.maximum(jnp.log(jnp.where(t > 0.5, p, 1.0 - p)),
                                  -100.0)
        else:
            # torch.nn.BCELoss clamps the log terms at -100.
            log_p = jnp.maximum(jnp.log(p), -100.0)
            log_1mp = jnp.maximum(jnp.log(1.0 - p), -100.0)
            # t*log_p + (1-t)*log_1mp rearranged; equals -BCE per element
            # (the negation is hoisted to the JAX glue).
            neg_bce = t * (log_p - log_1mp) + log_1mp

        def fold(x):
            # (block_rows, 128) -> (block_rows//8, 8, 128) -> (8, 128):
            # sublane-aligned vreg adds only, no cross-lane movement.
            return jnp.sum(x.reshape(-1, SUBLANES, LANES), axis=0)

        acc_ref[0] += fold(neg_bce)
        acc_ref[1] += fold(p * t)
        acc_ref[2] += fold(p + t)

    if not has_ragged:
        accumulate(p_ref[...].astype(jnp.float32),
                   t_ref[...].astype(jnp.float32))
    else:
        row_start = (pl.program_id(0) * steps + i) * block_rows
        is_full = row_start + block_rows <= rows

        @pl.when(is_full)
        def _full_block():
            accumulate(p_ref[...].astype(jnp.float32),
                       t_ref[...].astype(jnp.float32))

        @pl.when(jnp.logical_not(is_full))
        def _tail_block():
            # Block overhangs the array: rows past `rows` hold undefined data,
            # mask them to 0 (zero p/t contribute 0 to all three sums).
            rid = row_start + lax.broadcasted_iota(jnp.int32,
                                                   (block_rows, LANES), 0)
            valid = rid < rows
            accumulate(jnp.where(valid, p_ref[...].astype(jnp.float32), 0.0),
                       jnp.where(valid, t_ref[...].astype(jnp.float32), 0.0))

    @pl.when(i == steps - 1)
    def _finalize():
        # In-kernel cross-lane reduction (XLU rides a free slot): pack the
        # three scalar sums at [k, 0, 0]; JAX glue reads 3 values per slice.
        s0 = jnp.sum(acc_ref[0])
        s1 = jnp.sum(acc_ref[1])
        s2 = jnp.sum(acc_ref[2])
        sub = lax.broadcasted_iota(jnp.int32, (SUBLANES, LANES), 0)
        lane = lax.broadcasted_iota(jnp.int32, (SUBLANES, LANES), 1)
        first = (sub == 0) & (lane == 0)
        acc_ref[0] = jnp.where(first, s0, 0.0)
        acc_ref[1] = jnp.where(first, s1, 0.0)
        acc_ref[2] = jnp.where(first, s2, 0.0)


@functools.partial(jax.jit,
                   static_argnames=("smooth", "binary_targets",
                                    "max_block_rows"))
def dice_bce_loss(inputs, targets, smooth=1.0, binary_targets=False,
                  max_block_rows=MAX_BLOCK_ROWS):
    """Pallas implementation of DiceBCELoss.forward (scalar output)."""
    p = inputs.reshape(-1)            # keep native dtype; cast in-kernel
    t = targets.reshape(-1)
    n = p.shape[0]
    if n == 0:                        # torch: mean over 0 elements -> NaN
        return jnp.float32(float("nan"))

    # Only pad to an (8, 128)-aligned length (<= 1023 extra elements).  The
    # common aligned case ships the inputs untouched (no extra HBM copy).
    # TODO(synk): handle the <1024-element ragged tail in-kernel too, to avoid
    # this small pad copy for unaligned sizes.
    padded_n = _round_up(n, ALIGN)
    if padded_n != n:
        p = jnp.pad(p, (0, padded_n - n))   # zeros contribute 0 to all sums
        t = jnp.pad(t, (0, padded_n - n))

    rows = padded_n // LANES                          # multiple of SUBLANES
    block_rows = min(_round_up(max_block_rows, SUBLANES), rows)
    num_slices = 2 if (_num_tensorcores() >= 2
                       and rows >= 2 * block_rows) else 1
    steps = _cdiv(rows, num_slices * block_rows)
    has_ragged = num_slices * steps * block_rows > rows
    last_block = _cdiv(rows, block_rows) - 1          # clamp target

    p2 = p.reshape(rows, LANES)
    t2 = t.reshape(rows, LANES)

    kernel = functools.partial(
        _dice_bce_kernel, rows=rows, steps=steps, block_rows=block_rows,
        has_ragged=has_ragged, binary_targets=binary_targets)

    # Clamp the block index so any overrun grid step re-reads an in-bounds
    # block (its contribution is masked to zero in-kernel anyway).
    in_spec = pl.BlockSpec(
        (block_rows, LANES),
        lambda c, i: (jnp.minimum(c * steps + i, last_block), 0))
    out_spec = pl.BlockSpec((3, SUBLANES, LANES), lambda c, i: (c, 0, 0))

    partials = pl.pallas_call(
        kernel,
        out_shape=jax.ShapeDtypeStruct((num_slices * 3, SUBLANES, LANES),
                                       jnp.float32),
        grid_spec=pltpu.PrefetchScalarGridSpec(
            num_scalar_prefetch=0,
            grid=(num_slices, steps),
            in_specs=[in_spec, in_spec],
            out_specs=out_spec,
        ),
        compiler_params=pltpu.CompilerParams(
            # TODO(synk): on v7x verify both TensorCores pick up the leading
            # axis; switch to pltpu.CORE_PARALLEL if "parallel" doesn't shard.
            dimension_semantics=("parallel", "arbitrary")),
    )(p2, t2)

    # 3 scalars per slice live at [k, 0, 0]; everything else is zero.
    sums = partials.reshape(num_slices, 3, SUBLANES, LANES)[:, :, 0, 0]
    sums = sums.sum(axis=0)
    bce_loss = -sums[0] / jnp.float32(n)
    dice_loss = 1.0 - (2.0 * sums[1] + smooth) / (sums[2] + smooth)
    return bce_loss + dice_loss


def _reference_loss(inputs, targets, smooth=1.0):
    p = inputs.reshape(-1).astype(jnp.float32)
    t = targets.reshape(-1).astype(jnp.float32)
    log_p = jnp.maximum(jnp.log(p), -100.0)
    log_1mp = jnp.maximum(jnp.log(1.0 - p), -100.0)
    bce = jnp.mean(-(t * log_p + (1.0 - t) * log_1mp))
    inter = jnp.sum(p * t)
    dice = 1.0 - (2.0 * inter + smooth) / (jnp.sum(p) + jnp.sum(t) + smooth)
    return bce + dice


if __name__ == "__main__":
    key = jax.random.PRNGKey(0)
    k1, k2 = jax.random.split(key)

    # inputs: sigmoid probabilities (as nn.BCELoss expects); targets: {0,1}.
    shape = (2, 4, 16, 16)  # NCHW
    inputs = jax.nn.sigmoid(jax.random.normal(k1, shape, dtype=jnp.float32))
    targets = (jax.random.uniform(k2, shape) > 0.5).astype(jnp.float32)

    loss = dice_bce_loss(inputs, targets, smooth=1.0)
    loss = jax.block_until_ready(loss)
    ref = _reference_loss(inputs, targets, smooth=1.0)
    assert jnp.allclose(loss, ref, rtol=1e-5, atol=1e-5), (loss, ref)

    # Also exercise the ragged path (unaligned size + in-kernel tail masking)
    # at a small size by capping the block rows.
    shape2 = (3, 10, 10, 10)   # 3000 elements -> pads to 3072 (24 rows)
    k3, k4 = jax.random.split(k2)
    inputs2 = jax.nn.sigmoid(jax.random.normal(k3, shape2, dtype=jnp.float32))
    targets2 = (jax.random.uniform(k4, shape2) > 0.5).astype(jnp.float32)
    loss2 = dice_bce_loss(inputs2, targets2, smooth=1.0, max_block_rows=16)
    loss2 = jax.block_until_ready(loss2)
    ref2 = _reference_loss(inputs2, targets2, smooth=1.0)
    assert jnp.allclose(loss2, ref2, rtol=1e-5, atol=1e-5), (loss2, ref2)

    print("KERNEL_OK")
</pallas_src>

<mosaic_0001>
module attributes {stable_mosaic.version = 11 : i64} {
  func.func @_dice_bce_kernel(%arg0: i32, %arg1: i32, %arg2: memref<16x128xf32, #tpu.memory_space<vmem>>, %arg3: memref<16x128xf32, #tpu.memory_space<vmem>>, %arg4: memref<3x8x128xf32, #tpu.memory_space<vmem>>) attributes {dimension_semantics = [#tpu.dimension_semantics<parallel>, #tpu.dimension_semantics<arbitrary>], iteration_bounds = array<i64: 1, 1>, scalar_prefetch = 0 : i64, scratch_operands = 0 : i64, tpu.core_type = #tpu.core_type<tc>, window_params = [{transform_indices = @transform_0, window_bounds = array<i64: 16, 128>}, {transform_indices = @transform_1, window_bounds = array<i64: 16, 128>}, {transform_indices = @transform_2, window_bounds = array<i64: 3, 8, 128>}]} {
    %c0_i32 = arith.constant 0 : i32
    %0 = arith.cmpi eq, %arg1, %c0_i32 : i32
    %1 = arith.extui %0 : i1 to i32
    %c0_i32_0 = arith.constant 0 : i32
    %2 = arith.cmpi ne, %1, %c0_i32_0 : i32
    scf.if %2 {
      %cst_27 = arith.constant 0.000000e+00 : f32
      %45 = vector.broadcast %cst_27 : f32 to vector<3x8x128xf32>
      %c0_28 = arith.constant 0 : index
      %c0_29 = arith.constant 0 : index
      %c0_30 = arith.constant 0 : index
      %46 = vector.load %arg4[%c0_28, %c0_29, %c0_30] : memref<3x8x128xf32, #tpu.memory_space<vmem>>, vector<3x8x128xf32>
      tpu.vector_store %arg4[%c0_28, %c0_29, %c0_30], %45 {strides = array<i32>} : memref<3x8x128xf32, #tpu.memory_space<vmem>>, vector<3x8x128xf32>,
    } else {
    }
    %c0 = arith.constant 0 : index
    %c0_1 = arith.constant 0 : index
    %3 = vector.load %arg2[%c0, %c0_1] : memref<16x128xf32, #tpu.memory_space<vmem>>, vector<16x128xf32>
    %c0_2 = arith.constant 0 : index
    %c0_3 = arith.constant 0 : index
    %4 = vector.load %arg3[%c0_2, %c0_3] : memref<16x128xf32, #tpu.memory_space<vmem>>, vector<16x128xf32>
    %5 = math.log %3 : vector<16x128xf32>
    %cst = arith.constant -1.000000e+02 : f32
    %6 = vector.broadcast %cst : f32 to vector<16x128xf32>
    %7 = arith.maximumf %5, %6 : vector<16x128xf32>
    %cst_4 = arith.constant 1.000000e+00 : f32
    %8 = vector.broadcast %cst_4 : f32 to vector<16x128xf32>
    %9 = arith.subf %8, %3 : vector<16x128xf32>
    %10 = math.log %9 : vector<16x128xf32>
    %cst_5 = arith.constant -1.000000e+02 : f32
    %11 = vector.broadcast %cst_5 : f32 to vector<16x128xf32>
    %12 = arith.maximumf %10, %11 : vector<16x128xf32>
    %13 = arith.subf %7, %12 : vector<16x128xf32>
    %14 = arith.mulf %4, %13 : vector<16x128xf32>
    %15 = arith.addf %14, %12 : vector<16x128xf32>
    %c0_6 = arith.constant 0 : index
    %c0_7 = arith.constant 0 : index
    %c0_8 = arith.constant 0 : index
    %16 = vector.load %arg4[%c0_6, %c0_7, %c0_8] : memref<3x8x128xf32, #tpu.memory_space<vmem>>, vector<1x8x128xf32>
    %17 = vector.shape_cast %16 : vector<1x8x128xf32> to vector<8x128xf32>
    %18 = vector.shape_cast %15 : vector<16x128xf32> to vector<2x8x128xf32>
    %cst_9 = arith.constant dense<0.000000e+00> : vector<8x128xf32>
    %19 = vector.multi_reduction <add>, %18, %cst_9 [0] : vector<2x8x128xf32> to vector<8x128xf32>
    %20 = arith.addf %17, %19 : vector<8x128xf32>
    %c0_10 = arith.constant 0 : index
    %c0_11 = arith.constant 0 : index
    %c0_12 = arith.constant 0 : index
    %21 = vector.load %arg4[%c0_10, %c0_11, %c0_12] : memref<3x8x128xf32, #tpu.memory_space<vmem>>, vector<1x8x128xf32>
    %22 = vector.shape_cast %21 : vector<1x8x128xf32> to vector<8x128xf32>
    %23 = vector.shape_cast %20 : vector<8x128xf32> to vector<1x8x128xf32>
    tpu.vector_store %arg4[%c0_10, %c0_11, %c0_12], %23 {strides = array<i32>} : memref<3x8x128xf32, #tpu.memory_space<vmem>>, vector<1x8x128xf32>,
    %c1 = arith.constant 1 : index
    %c0_13 = arith.constant 0 : index
    %c0_14 = arith.constant 0 : index
    %24 = vector.load %arg4[%c1, %c0_13, %c0_14] : memref<3x8x128xf32, #tpu.memory_space<vmem>>, vector<1x8x128xf32>
    %25 = vector.shape_cast %24 : vector<1x8x128xf32> to vector<8x128xf32>
    %26 = arith.mulf %3, %4 : vector<16x128xf32>
    %27 = vector.shape_cast %26 : vector<16x128xf32> to vector<2x8x128xf32>
    %cst_15 = arith.constant dense<0.000000e+00> : vector<8x128xf32>
    %28 = vector.multi_reduction <add>, %27, %cst_15 [0] : vector<2x8x128xf32> to vector<8x128xf32>
    %29 = arith.addf %25, %28 : vector<8x128xf32>
    %c1_16 = arith.constant 1 : index
    %c0_17 = arith.constant 0 : index
    %c0_18 = arith.constant 0 : index
    %30 = vector.load %arg4[%c1_16, %c0_17, %c0_18] : memref<3x8x128xf32, #tpu.memory_space<vmem>>, vector<1x8x128xf32>
    %31 = vector.shape_cast %30 : vector<1x8x128xf32> to vector<8x128xf32>
    %32 = vector.shape_cast %29 : vector<8x128xf32> to vector<1x8x128xf32>
    tpu.vector_store %arg4[%c1_16, %c0_17, %c0_18], %32 {strides = array<i32>} : memref<3x8x128xf32, #tpu.memory_space<vmem>>, vector<1x8x128xf32>,
    %c2 = arith.constant 2 : index
    %c0_19 = arith.constant 0 : index
    %c0_20 = arith.constant 0 : index
    %33 = vector.load %arg4[%c2, %c0_19, %c0_20] : memref<3x8x128xf32, #tpu.memory_space<vmem>>, vector<1x8x128xf32>
    %34 = vector.shape_cast %33 : vector<1x8x128xf32> to vector<8x128xf32>
    %35 = arith.addf %3, %4 : vector<16x128xf32>
    %36 = vector.shape_cast %35 : vector<16x128xf32> to vector<2x8x128xf32>
    %cst_21 = arith.constant dense<0.000000e+00> : vector<8x128xf32>
    %37 = vector.multi_reduction <add>, %36, %cst_21 [0] : vector<2x8x128xf32> to vector<8x128xf32>
    %38 = arith.addf %34, %37 : vector<8x128xf32>
    %c2_22 = arith.constant 2 : index
    %c0_23 = arith.constant 0 : index
    %c0_24 = arith.constant 0 : index
    %39 = vector.load %arg4[%c2_22, %c0_23, %c0_24] : memref<3x8x128xf32, #tpu.memory_space<vmem>>, vector<1x8x128xf32>
    %40 = vector.shape_cast %39 : vector<1x8x128xf32> to vector<8x128xf32>
    %41 = vector.shape_cast %38 : vector<8x128xf32> to vector<1x8x128xf32>
    tpu.vector_store %arg4[%c2_22, %c0_23, %c0_24], %41 {strides = array<i32>} : memref<3x8x128xf32, #tpu.memory_space<vmem>>, vector<1x8x128xf32>,
    %c0_i32_25 = arith.constant 0 : i32
    %42 = arith.cmpi eq, %arg1, %c0_i32_25 : i32
    %43 = arith.extui %42 : i1 to i32
    %c0_i32_26 = arith.constant 0 : i32
    %44 = arith.cmpi ne, %43, %c0_i32_26 : i32
    scf.if %44 {
      %c0_27 = arith.constant 0 : index
      %c0_28 = arith.constant 0 : index
      %c0_29 = arith.constant 0 : index
      %45 = vector.load %arg4[%c0_27, %c0_28, %c0_29] : memref<3x8x128xf32, #tpu.memory_space<vmem>>, vector<1x8x128xf32>
      %46 = vector.shape_cast %45 : vector<1x8x128xf32> to vector<8x128xf32>
      %47 = vector.shape_cast %46 : vector<8x128xf32> to vector<1x8x128xf32>
      %cst_30 = arith.constant dense<0.000000e+00> : vector<1xf32>
      %48 = vector.multi_reduction <add>, %47, %cst_30 [1, 2] : vector<1x8x128xf32> to vector<1xf32>
      %49 = vector.shape_cast %48 : vector<1xf32> to vector<1x1x1xf32>
      %50 = vector.extract %49[0, 0, 0] : f32 from vector<1x1x1xf32>
      %c1_31 = arith.constant 1 : index
      %c0_32 = arith.constant 0 : index
      %c0_33 = arith.constant 0 : index
      %51 = vector.load %arg4[%c1_31, %c0_32, %c0_33] : memref<3x8x128xf32, #tpu.memory_space<vmem>>, vector<1x8x128xf32>
      %52 = vector.shape_cast %51 : vector<1x8x128xf32> to vector<8x128xf32>
      %53 = vector.shape_cast %52 : vector<8x128xf32> to vector<1x8x128xf32>
      %cst_34 = arith.constant dense<0.000000e+00> : vector<1xf32>
      %54 = vector.multi_reduction <add>, %53, %cst_34 [1, 2] : vector<1x8x128xf32> to vector<1xf32>
      %55 = vector.shape_cast %54 : vector<1xf32> to vector<1x1x1xf32>
      %56 = vector.extract %55[0, 0, 0] : f32 from vector<1x1x1xf32>
      %c2_35 = arith.constant 2 : index
      %c0_36 = arith.constant 0 : index
      %c0_37 = arith.constant 0 : index
      %57 = vector.load %arg4[%c2_35, %c0_36, %c0_37] : memref<3x8x128xf32, #tpu.memory_space<vmem>>, vector<1x8x128xf32>
      %58 = vector.shape_cast %57 : vector<1x8x128xf32> to vector<8x128xf32>
      %59 = vector.shape_cast %58 : vector<8x128xf32> to vector<1x8x128xf32>
      %cst_38 = arith.constant dense<0.000000e+00> : vector<1xf32>
      %60 = vector.multi_reduction <add>, %59, %cst_38 [1, 2] : vector<1x8x128xf32> to vector<1xf32>
      %61 = vector.shape_cast %60 : vector<1xf32> to vector<1x1x1xf32>
      %62 = vector.extract %61[0, 0, 0] : f32 from vector<1x1x1xf32>
      %63 = tpu.iota {dimensions = array<i32: 0>} : vector<8x128xi32>
      %64 = tpu.iota {dimensions = array<i32: 1>} : vector<8x128xi32>
      %c0_i32_39 = arith.constant 0 : i32
      %65 = vector.broadcast %c0_i32_39 : i32 to vector<8x128xi32>
      %66 = arith.cmpi eq, %63, %65 : vector<8x128xi32>
      %c0_i32_40 = arith.constant 0 : i32
      %67 = vector.broadcast %c0_i32_40 : i32 to vector<8x128xi32>
      %68 = arith.cmpi eq, %64, %67 : vector<8x128xi32>
      %69 = arith.andi %66, %68 : vector<8x128xi1>
      %cst_41 = arith.constant 0.000000e+00 : f32
      %70 = vector.broadcast %50 : f32 to vector<8x128xf32>
      %71 = vector.broadcast %cst_41 : f32 to vector<8x128xf32>
      %72 = arith.select %69, %70, %71 : vector<8x128xi1>, vector<8x128xf32>
      %c0_42 = arith.constant 0 : index
      %c0_43 = arith.constant 0 : index
      %c0_44 = arith.constant 0 : index
      %73 = vector.load %arg4[%c0_42, %c0_43, %c0_44] : memref<3x8x128xf32, #tpu.memory_space<vmem>>, vector<1x8x128xf32>
      %74 = vector.shape_cast %73 : vector<1x8x128xf32> to vector<8x128xf32>
      %75 = vector.shape_cast %72 : vector<8x128xf32> to vector<1x8x128xf32>
      tpu.vector_store %arg4[%c0_42, %c0_43, %c0_44], %75 {strides = array<i32>} : memref<3x8x128xf32, #tpu.memory_space<vmem>>, vector<1x8x128xf32>,
      %cst_45 = arith.constant 0.000000e+00 : f32
      %76 = vector.broadcast %56 : f32 to vector<8x128xf32>
      %77 = vector.broadcast %cst_45 : f32 to vector<8x128xf32>
      %78 = arith.select %69, %76, %77 : vector<8x128xi1>, vector<8x128xf32>
      %c1_46 = arith.constant 1 : index
      %c0_47 = arith.constant 0 : index
      %c0_48 = arith.constant 0 : index
      %79 = vector.load %arg4[%c1_46, %c0_47, %c0_48] : memref<3x8x128xf32, #tpu.memory_space<vmem>>, vector<1x8x128xf32>
      %80 = vector.shape_cast %79 : vector<1x8x128xf32> to vector<8x128xf32>
      %81 = vector.shape_cast %78 : vector<8x128xf32> to vector<1x8x128xf32>
      tpu.vector_store %arg4[%c1_46, %c0_47, %c0_48], %81 {strides = array<i32>} : memref<3x8x128xf32, #tpu.memory_space<vmem>>, vector<1x8x128xf32>,
      %cst_49 = arith.constant 0.000000e+00 : f32
      %82 = vector.broadcast %62 : f32 to vector<8x128xf32>
      %83 = vector.broadcast %cst_49 : f32 to vector<8x128xf32>
      %84 = arith.select %69, %82, %83 : vector<8x128xi1>, vector<8x128xf32>
      %c2_50 = arith.constant 2 : index
      %c0_51 = arith.constant 0 : index
      %c0_52 = arith.constant 0 : index
      %85 = vector.load %arg4[%c2_50, %c0_51, %c0_52] : memref<3x8x128xf32, #tpu.memory_space<vmem>>, vector<1x8x128xf32>
      %86 = vector.shape_cast %85 : vector<1x8x128xf32> to vector<8x128xf32>
      %87 = vector.shape_cast %84 : vector<8x128xf32> to vector<1x8x128xf32>
      tpu.vector_store %arg4[%c2_50, %c0_51, %c0_52], %87 {strides = array<i32>} : memref<3x8x128xf32, #tpu.memory_space<vmem>>, vector<1x8x128xf32>,
    } else {
    }
    return
  }
  func.func @transform_0(%arg0: i32, %arg1: i32) -> (i32, i32) {
    %c1_i32 = arith.constant 1 : i32
    %0 = arith.muli %arg0, %c1_i32 : i32
    %1 = arith.addi %0, %arg1 : i32
    %c0_i32 = arith.constant 0 : i32
    %2 = arith.minsi %1, %c0_i32 : i32
    %c0_i32_0 = arith.constant 0 : i32
    %c0_i32_1 = arith.constant 0 : i32
    return %2, %c0_i32_0 : i32, i32
  }
  func.func @transform_1(%arg0: i32, %arg1: i32) -> (i32, i32) {
    %c1_i32 = arith.constant 1 : i32
    %0 = arith.muli %arg0, %c1_i32 : i32
    %1 = arith.addi %0, %arg1 : i32
    %c0_i32 = arith.constant 0 : i32
    %2 = arith.minsi %1, %c0_i32 : i32
    %c0_i32_0 = arith.constant 0 : i32
    %c0_i32_1 = arith.constant 0 : i32
    return %2, %c0_i32_0 : i32, i32
  }
  func.func @transform_2(%arg0: i32, %arg1: i32) -> (i32, i32, i32) {
    %c0_i32 = arith.constant 0 : i32
    %c0_i32_0 = arith.constant 0 : i32
    %c0_i32_1 = arith.constant 0 : i32
    return %arg0, %c0_i32, %c0_i32_0 : i32, i32, i32
  }
}

</mosaic_0001>

<bundles_post_ra>
// kernel: dice_bce_loss.1
= control target key start
LH: loop header
LB: loop body
LE: loop exit
PB: predicated region body
PF: predicated region fallthrough
CT: control target
= control target key end

     0   :  { %v157_v52 = vlaneseq  ;;  %s248_s0 = inlined_call_operand.vmem [shape: f32[16,128], index: 0, kind: input, shape index: {}]   ;;  %s249_s1 = inlined_call_operand.vmem [shape: f32[16,128], index: 1, kind: input, shape index: {}]   ;;  %s250_s2 = inlined_call_operand.vmem [shape: f32[3,8,128], index: 2, kind: output, shape index: {}]  }
   0x1   :  { %v82_v0 = vld [vmem:[%s248_s0] sm:$0xff]  ;;  %v83_v1 = vld [vmem:[%s248_s0 + $0x8] sm:$0xff] }
   0x2   :  { %v84_v2 = vld [vmem:[%s249_s1] sm:$0xff]  ;;  %v85_v3 = vld [vmem:[%s249_s1 + $0x8] sm:$0xff]  ;;  %204 = vlog2.f32 %v83_v1  ;;  %v92_v5 = vsub.f32 1.0, %v82_v0  ;;  %v93_v6 = vsub.f32 1.0, %v83_v1  ;;  %v158_v53 = vshrl.u32 %v157_v52, 7 }
   0x3   :  { %v119_v4 = vadd.f32 %v84_v2, %v82_v0  ;;  %v120_v7 = vadd.f32 %v85_v3, %v83_v1  ;;  %206 = vlog2.f32 %v82_v0  ;;  %v112_v25 = vmul.f32 %v84_v2, %v82_v0 }
   0x4   :  { %208 = vlog2.f32 %v92_v5  ;;  %v113_v26 = vmul.f32 %v85_v3, %v83_v1  ;;  %v160_v54 = vand.u32 127, %v157_v52  ;;  %vm161_vm0 = vcmp.eq.s32.totalorder %v158_v53, 0 }
   0x5   :  { %v121_v8 = vadd.f32 %v120_v7, %v119_v4  ;;  %210 = vlog2.f32 %v93_v6 }
   0x6   :  { %v114_v30 = vadd.f32 %v113_v26, %v112_v25  ;;  %vm162_vm1 = vcmp.eq.s32.totalorder %v160_v54, 0 }
   0x7   :  { %148 = vadd.xlane.f32.xlu1 %v121_v8  ;;  %vm163_vm2 = vmand %vm161_vm0, %vm162_vm1 }
   0xc   :  { %v205_v9 = vpop.eup %204 }
   0xd   :  { %v207_v10 = vpop.eup %206  ;;  %v89_v11 = vmul.f32 0.6931472, %v205_v9 }
   0xe   :  { %v209_v12 = vpop.eup %208  ;;  %v87_v13 = vmul.f32 0.6931472, %v207_v10 }
   0xf   :  { %v211_v14 = vpop.eup %210  ;;  %v95_v15 = vmul.f32 0.6931472, %v209_v12  ;;  %v91_v17 = vmax.f32 %v89_v11, -100.0 }
  0x10   :  { %v90_v16 = vmax.f32 %v87_v13, -100.0  ;;  %v97_v18 = vmul.f32 0.6931472, %v211_v14 }
  0x11   :  { %v98_v19 = vmax.f32 %v95_v15, -100.0 }
  0x12   :  { %v99_v20 = vmax.f32 %v97_v18, -100.0 }
  0x13   :  { %v100_v21 = vsub.f32 %v90_v16, %v98_v19 }
  0x14   :  { %v101_v22 = vsub.f32 %v91_v17, %v99_v20 }
  0x15   :  { %v102_v23 = vmul.f32 %v100_v21, %v84_v2 }
  0x16   :  { %v103_v24 = vmul.f32 %v101_v22, %v85_v3 }
  0x17   :  { %v104_v27 = vadd.f32 %v102_v23, %v98_v19 }
  0x18   :  { %v105_v28 = vadd.f32 %v103_v24, %v99_v20 }
  0x1a   :  { %v107_v29 = vadd.f32 %v105_v28, %v104_v27 }
  0x1c   :  { %128 = vadd.xlane.f32.xlu0 %v107_v29 }
  0x20   :  { %138 = vadd.xlane.f32.xlu0 %v114_v30 }
  0x94   :  { %v149_v31 = vpop.xlane.xlu1 %148 }
  0x95   :  { %v150_v32 = vrot.slane %v149_v31, 4 }
  0x97   :  { %v151_v33 = vadd.f32 %v150_v32, %v149_v31 }
  0x99   :  { %v152_v37 = vrot.slane %v151_v33, 2 }
  0x9b   :  { %v153_v43 = vadd.f32 %v152_v37, %v151_v33 }
  0x9d   :  { %v154_v48 = vrot.slane %v153_v43, 1 }
  0x9f   :  { %v155_v51 = vadd.f32 %v154_v48, %v153_v43 }
  0xa9   :  { %v129_v34 = vpop.xlane.xlu0 %128 }
  0xaa   :  { %v130_v35 = vrot.slane %v129_v34, 4 }
  0xac   :  { %v131_v36 = vadd.f32 %v130_v35, %v129_v34 }
  0xad   :  { %v139_v38 = vpop.xlane.xlu0 %138 }
  0xae   :  { %v132_v39 = vrot.slane %v131_v36, 2  ;;  %v140_v40 = vrot.slane %v139_v38, 4 }
  0xb0   :  { %v141_v41 = vadd.f32 %v140_v40, %v139_v38  ;;  %v133_v42 = vadd.f32 %v132_v39, %v131_v36 }
  0xb2   :  { %v142_v44 = vrot.slane %v141_v41, 2  ;;  %v134_v45 = vrot.slane %v133_v42, 1 }
  0xb4   :  { %v143_v46 = vadd.f32 %v142_v44, %v141_v41  ;;  %v135_v47 = vadd.f32 %v134_v45, %v133_v42 }
  0xb6   :  { %197 = vpush %v135_v47  ;;  %v144_v49 = vrot.slane %v143_v46, 1 }
  0xb8   :  { %v145_v50 = vadd.f32 %v144_v49, %v143_v46 }
  0xba   :  { %199 = vpush %v145_v50 }
  0xbb   :  { %201 = vpush %v155_v51 }
  0xe7   :  { %s198_s0 = spop %197 }
  0xe8   :  { %v164_v55 = vstv %s198_s0 }
  0xe9   :  { %v165_v56 = vsel %vm163_vm2, %v164_v55, 0.0 }
  0xea   :  { %166 = vst [vmem:[%s250_s2] sm:$0xff] %v165_v56 }
  0xeb   :  { %s200_s18 = spop %199 }
  0xec   :  { %v167_v57 = vstv %s200_s18  ;;  %s202_s19 = spop %201 }
  0xed   :  { %v168_v58 = vsel %vm163_vm2, %v167_v57, 0.0  ;;  %v170_v59 = vstv %s202_s19 }
  0xee   :  { %195 = vst [vmem:[%s250_s2 + $0x8] sm:$0xff] %v168_v58  ;;  %v171_v60 = vsel %vm163_vm2, %v170_v59, 0.0 }
  0xef   :  { %196 = vst [vmem:[%s250_s2 + $0x10] sm:$0xff] %v171_v60 }

</bundles_post_ra>
